<compile_context>
chip_gen: v6e
topology: v6e:2x2x1
jax: 0.10.0
libtpu: 0.0.40
codegen_flags: <defaults>
</compile_context>

<pallas_src>
import jax
import jax.numpy as jnp
from jax.experimental import pallas as pl
from jax.experimental.pallas import tpu as pltpu


def _choose_spatial_tile(P, C, target_bytes=4 << 20):
    """Largest multiple of 128 dividing P whose (C, TP) f32 tile fits target_bytes."""
    if P % 128 != 0:
        return P                      # fall back to an untiled spatial axis
    max_cols = max(128, ((target_bytes // (4 * C)) // 128) * 128)
    tp = min(P, max_cols)
    while P % tp != 0:
        tp -= 128
    return tp


def _stats_kernel(x_ref, s_ref, m_ref):
    # grid = (B, P // TP); the spatial axis is the reduction -> accumulate in
    # the resident output blocks, zeroed on the first spatial tile per batch.
    @pl.when(pl.program_id(1) == 0)
    def _():
        s_ref[...] = jnp.zeros_like(s_ref)
        m_ref[...] = jnp.zeros_like(m_ref)

    xt = x_ref[0]                                              # (C, TP) f32
    # f32 Gram accumulation of the raw input (kept f32 for eigh stability).
    s_ref[0] = s_ref[0] + jax.lax.dot_general(
        xt, xt, (((1,), (1,)), ((), ())),
        preferred_element_type=jnp.float32)                    # (C, C)
    m_ref[0] = m_ref[0] + jnp.sum(xt, axis=-1, keepdims=True)  # (C, 1)


def _apply_kernel(wf_ref, bf_ref, x_ref, out_ref):
    # out = x + W_fold @ x + bias_fold  (single well-shaped (C,C)@(C,TP) matmul)
    xt = x_ref[0]                                              # (C, TP) f32
    att = jnp.dot(wf_ref[0].astype(jnp.bfloat16),
                  xt.astype(jnp.bfloat16),
                  preferred_element_type=jnp.float32) + bf_ref[0]
    out_ref[0] = xt + att


@jax.jit
def sapca_block_v3(x, w1, b1, w2, b2):
    """x: (B, C, H, W) float32 (NCHW, like PyTorch). Returns (B, C, H, W)."""
    B, C, H, W = x.shape
    P = H * W
    C4 = C // 4
    TP = _choose_spatial_tile(P, C)
    n_p = P // TP

    x_flat = x.reshape(B, C, P)

    # ---- kernel 1: per-batch raw second/first moments of x -------------------
    s_sum, m_sum = pl.pallas_call(
        _stats_kernel,
        out_shape=(jax.ShapeDtypeStruct((B, C, C), jnp.float32),
                   jax.ShapeDtypeStruct((B, C, 1), jnp.float32)),
        grid_spec=pltpu.PrefetchScalarGridSpec(
            num_scalar_prefetch=0,
            grid=(B, n_p),
            in_specs=[
                pl.BlockSpec((1, C, TP), lambda b, p: (b, 0, p)),
            ],
            out_specs=(
                pl.BlockSpec((1, C, C), lambda b, p: (b, 0, 0)),
                pl.BlockSpec((1, C, 1), lambda b, p: (b, 0, 0)),
            ),
        ),
        compiler_params=pltpu.CompilerParams(
            dimension_semantics=("parallel", "arbitrary"),
            vmem_limit_bytes=40 * 1024 * 1024),
    )(x_flat)

    # ---- eigendecomposition + fold (plain JAX on tiny (B, C, C) tensors) -----
    # TODO(synk): symmetric eigendecomposition has no Pallas TPU equivalent;
    # torch.symeig(eigenvectors=True) (ascending) == jnp.linalg.eigh.  For
    # large B this could be offloaded to CPU (pure_callback) or overlapped
    # with unrelated work.
    mu_x = m_sum / P                                            # (B, C, 1)
    g_x = s_sum - P * (mu_x @ jnp.swapaxes(mu_x, -1, -2))       # centered Gram of x
    cmat = jnp.einsum('ik,bkl,jl->bij', w1, g_x, w1) / B        # W1 G W1^T / B
    _, eigvec = jnp.linalg.eigh(cmat)                           # ascending eigvals
    w_top = jnp.swapaxes(eigvec[:, :, C - C4:], -1, -2)         # (B, C4, C)

    w_fold = jnp.einsum('ok,bkc,ci->boi', w2, w_top, w1)        # (B, C, C) = w2 @ wtop @ w1
    bias_fold = b2.reshape(1, C, 1) - w_fold @ mu_x             # (B, C, 1)

    # ---- kernel 2: out = x + W_fold @ x + bias_fold ---------------------------
    out = pl.pallas_call(
        _apply_kernel,
        out_shape=jax.ShapeDtypeStruct((B, C, P), jnp.float32),
        grid_spec=pltpu.PrefetchScalarGridSpec(
            num_scalar_prefetch=0,
            grid=(B, n_p),
            in_specs=[
                pl.BlockSpec((1, C, C), lambda b, p: (b, 0, 0)),
                pl.BlockSpec((1, C, 1), lambda b, p: (b, 0, 0)),
                pl.BlockSpec((1, C, TP), lambda b, p: (b, 0, p)),
            ],
            out_specs=pl.BlockSpec((1, C, TP), lambda b, p: (b, 0, p)),
        ),
        compiler_params=pltpu.CompilerParams(
            dimension_semantics=("parallel", "parallel"),
            vmem_limit_bytes=40 * 1024 * 1024),
    )(w_fold, bias_fold, x_flat)

    return out.reshape(B, C, H, W)


def _ref_forward(x, w1, b1, w2, b2):
    """Pure-JAX f32 reference mirroring SAPCABlockV3.forward."""
    B, C, H, W = x.shape
    xf = x.reshape(B, C, -1)
    gx = jnp.einsum('oc,bcp->bop', w1, xf) + b1[None, :, None]
    gx_c = gx - jnp.mean(gx, axis=-1, keepdims=True)
    cmat = jnp.einsum('bcp,bdp->bcd', gx_c, gx_c) / B
    _, eigvec = jnp.linalg.eigh(cmat)
    wtop = jnp.swapaxes(eigvec[:, :, -(C // 4):], -1, -2)
    y = jnp.einsum('bkc,bcp->bkp', wtop, gx_c)
    att = jnp.einsum('ok,bkp->bop', w2, y) + b2[None, :, None]
    return (xf + att).reshape(B, C, H, W)


if __name__ == "__main__":
    B, C, H, W = 2, 8, 16, 16            # in_channels must be divisible by 4
    key = jax.random.PRNGKey(0)
    k1, k2, k3, k4, kx = jax.random.split(key, 5)

    # Parameter shapes from SAPCABlockV3.__init__ (1x1 convs, squeezed):
    #   conv1: Conv2d(C, C, 1)    -> weight (C, C),    bias (C,)
    #   conv2: Conv2d(C//4, C, 1) -> weight (C, C//4), bias (C,)
    #   prelu: defined but unused in forward()
    w1 = jax.random.normal(k1, (C, C), jnp.float32) * 0.1
    b1 = jax.random.normal(k2, (C,), jnp.float32) * 0.1
    w2 = jax.random.normal(k3, (C, C // 4), jnp.float32) * 0.1
    b2 = jax.random.normal(k4, (C,), jnp.float32) * 0.1

    x = jax.random.normal(kx, (B, C, H, W), jnp.float32)

    out = jax.block_until_ready(sapca_block_v3(x, w1, b1, w2, b2))
    assert out.shape == (B, C, H, W)
    assert bool(jnp.all(jnp.isfinite(out)))

    ref = jax.block_until_ready(_ref_forward(x, w1, b1, w2, b2))
    assert bool(jnp.allclose(out, ref, rtol=1e-1, atol=1e-1)), \
        f"max abs diff {float(jnp.max(jnp.abs(out - ref)))}"

    print("KERNEL_OK")
</pallas_src>

<mosaic_0001>
module attributes {stable_mosaic.version = 11 : i64} {
  func.func @_stats_kernel(%arg0: i32, %arg1: i32, %arg2: memref<1x8x256xf32, #tpu.memory_space<vmem>>, %arg3: memref<1x8x8xf32, #tpu.memory_space<vmem>>, %arg4: memref<1x8x1xf32, #tpu.memory_space<vmem>>) attributes {dimension_semantics = [#tpu.dimension_semantics<parallel>, #tpu.dimension_semantics<arbitrary>], iteration_bounds = array<i64: 2, 1>, scalar_prefetch = 0 : i64, scratch_operands = 0 : i64, tpu.core_type = #tpu.core_type<tc>, window_params = [{transform_indices = @transform_0, window_bounds = array<i64: 1, 8, 256>}, {transform_indices = @transform_1, window_bounds = array<i64: 1, 8, 8>}, {transform_indices = @transform_2, window_bounds = array<i64: 1, 8, 1>}]} {
    %c0_i32 = arith.constant 0 : i32
    %0 = arith.cmpi eq, %arg1, %c0_i32 : i32
    %1 = arith.extui %0 : i1 to i32
    %c0_i32_0 = arith.constant 0 : i32
    %2 = arith.cmpi ne, %1, %c0_i32_0 : i32
    scf.if %2 {
      %cst_16 = arith.constant 0.000000e+00 : f32
      %20 = vector.broadcast %cst_16 : f32 to vector<1x8x8xf32>
      %c0_17 = arith.constant 0 : index
      %c0_18 = arith.constant 0 : index
      %c0_19 = arith.constant 0 : index
      %21 = vector.load %arg3[%c0_17, %c0_18, %c0_19] : memref<1x8x8xf32, #tpu.memory_space<vmem>>, vector<1x8x8xf32>
      tpu.vector_store %arg3[%c0_17, %c0_18, %c0_19], %20 {strides = array<i32>} : memref<1x8x8xf32, #tpu.memory_space<vmem>>, vector<1x8x8xf32>,
      %cst_20 = arith.constant 0.000000e+00 : f32
      %22 = vector.broadcast %cst_20 : f32 to vector<1x8x1xf32>
      %c0_21 = arith.constant 0 : index
      %c0_22 = arith.constant 0 : index
      %c0_23 = arith.constant 0 : index
      %23 = vector.load %arg4[%c0_21, %c0_22, %c0_23] : memref<1x8x1xf32, #tpu.memory_space<vmem>>, vector<1x8x1xf32>
      tpu.vector_store %arg4[%c0_21, %c0_22, %c0_23], %22 {strides = array<i32>} : memref<1x8x1xf32, #tpu.memory_space<vmem>>, vector<1x8x1xf32>,
    } else {
    }
    %c0 = arith.constant 0 : index
    %c0_1 = arith.constant 0 : index
    %c0_2 = arith.constant 0 : index
    %3 = vector.load %arg2[%c0, %c0_1, %c0_2] : memref<1x8x256xf32, #tpu.memory_space<vmem>>, vector<1x8x256xf32>
    %4 = vector.shape_cast %3 : vector<1x8x256xf32> to vector<8x256xf32>
    %c0_3 = arith.constant 0 : index
    %c0_4 = arith.constant 0 : index
    %c0_5 = arith.constant 0 : index
    %5 = vector.load %arg3[%c0_3, %c0_4, %c0_5] : memref<1x8x8xf32, #tpu.memory_space<vmem>>, vector<1x8x8xf32>
    %6 = vector.shape_cast %5 : vector<1x8x8xf32> to vector<8x8xf32>
    %cst = arith.constant dense<0.000000e+00> : vector<8x8xf32>
    %7 = tpu.matmul %4, %4, %cst {dimension_numbers = #tpu.dot_dimension_numbers<[1], [1], [0], [0], [0, 0, 1, 0], [], []>} : vector<8x256xf32>, vector<8x256xf32>, vector<8x8xf32> -> vector<8x8xf32>
    %8 = arith.addf %6, %7 : vector<8x8xf32>
    %c0_6 = arith.constant 0 : index
    %c0_7 = arith.constant 0 : index
    %c0_8 = arith.constant 0 : index
    %9 = vector.load %arg3[%c0_6, %c0_7, %c0_8] : memref<1x8x8xf32, #tpu.memory_space<vmem>>, vector<1x8x8xf32>
    %10 = vector.shape_cast %9 : vector<1x8x8xf32> to vector<8x8xf32>
    %11 = vector.shape_cast %8 : vector<8x8xf32> to vector<1x8x8xf32>
    tpu.vector_store %arg3[%c0_6, %c0_7, %c0_8], %11 {strides = array<i32>} : memref<1x8x8xf32, #tpu.memory_space<vmem>>, vector<1x8x8xf32>,
    %c0_9 = arith.constant 0 : index
    %c0_10 = arith.constant 0 : index
    %c0_11 = arith.constant 0 : index
    %12 = vector.load %arg4[%c0_9, %c0_10, %c0_11] : memref<1x8x1xf32, #tpu.memory_space<vmem>>, vector<1x8x1xf32>
    %13 = vector.shape_cast %12 : vector<1x8x1xf32> to vector<8x1xf32>
    %cst_12 = arith.constant dense<0.000000e+00> : vector<8xf32>
    %14 = vector.multi_reduction <add>, %4, %cst_12 [1] : vector<8x256xf32> to vector<8xf32>
    %15 = vector.shape_cast %14 : vector<8xf32> to vector<8x1xf32>
    %16 = arith.addf %13, %15 : vector<8x1xf32>
    %c0_13 = arith.constant 0 : index
    %c0_14 = arith.constant 0 : index
    %c0_15 = arith.constant 0 : index
    %17 = vector.load %arg4[%c0_13, %c0_14, %c0_15] : memref<1x8x1xf32, #tpu.memory_space<vmem>>, vector<1x8x1xf32>
    %18 = vector.shape_cast %17 : vector<1x8x1xf32> to vector<8x1xf32>
    %19 = vector.shape_cast %16 : vector<8x1xf32> to vector<1x8x1xf32>
    tpu.vector_store %arg4[%c0_13, %c0_14, %c0_15], %19 {strides = array<i32>} : memref<1x8x1xf32, #tpu.memory_space<vmem>>, vector<1x8x1xf32>,
    return
  }
  func.func @transform_0(%arg0: i32, %arg1: i32) -> (i32, i32, i32) {
    %c0_i32 = arith.constant 0 : i32
    %c0_i32_0 = arith.constant 0 : i32
    return %arg0, %c0_i32, %arg1 : i32, i32, i32
  }
  func.func @transform_1(%arg0: i32, %arg1: i32) -> (i32, i32, i32) {
    %c0_i32 = arith.constant 0 : i32
    %c0_i32_0 = arith.constant 0 : i32
    %c0_i32_1 = arith.constant 0 : i32
    return %arg0, %c0_i32, %c0_i32_0 : i32, i32, i32
  }
  func.func @transform_2(%arg0: i32, %arg1: i32) -> (i32, i32, i32) {
    %c0_i32 = arith.constant 0 : i32
    %c0_i32_0 = arith.constant 0 : i32
    %c0_i32_1 = arith.constant 0 : i32
    return %arg0, %c0_i32, %c0_i32_0 : i32, i32, i32
  }
}

module attributes {stable_mosaic.version = 11 : i64} {
  func.func @_apply_kernel(%arg0: i32, %arg1: i32, %arg2: memref<1x8x8xf32, #tpu.memory_space<vmem>>, %arg3: memref<1x8x1xf32, #tpu.memory_space<vmem>>, %arg4: memref<1x8x256xf32, #tpu.memory_space<vmem>>, %arg5: memref<1x8x256xf32, #tpu.memory_space<vmem>>) attributes {dimension_semantics = [#tpu.dimension_semantics<parallel>, #tpu.dimension_semantics<parallel>], iteration_bounds = array<i64: 2, 1>, scalar_prefetch = 0 : i64, scratch_operands = 0 : i64, tpu.core_type = #tpu.core_type<tc>, window_params = [{transform_indices = @transform_0, window_bounds = array<i64: 1, 8, 8>}, {transform_indices = @transform_1, window_bounds = array<i64: 1, 8, 1>}, {transform_indices = @transform_2, window_bounds = array<i64: 1, 8, 256>}, {transform_indices = @transform_3, window_bounds = array<i64: 1, 8, 256>}]} {
    %c0 = arith.constant 0 : index
    %c0_0 = arith.constant 0 : index
    %c0_1 = arith.constant 0 : index
    %0 = vector.load %arg4[%c0, %c0_0, %c0_1] : memref<1x8x256xf32, #tpu.memory_space<vmem>>, vector<1x8x256xf32>
    %1 = vector.shape_cast %0 : vector<1x8x256xf32> to vector<8x256xf32>
    %c0_2 = arith.constant 0 : index
    %c0_3 = arith.constant 0 : index
    %c0_4 = arith.constant 0 : index
    %2 = vector.load %arg2[%c0_2, %c0_3, %c0_4] : memref<1x8x8xf32, #tpu.memory_space<vmem>>, vector<1x8x8xf32>
    %3 = vector.shape_cast %2 : vector<1x8x8xf32> to vector<8x8xf32>
    %4 = arith.truncf %3 : vector<8x8xf32> to vector<8x8xbf16>
    %5 = arith.truncf %1 : vector<8x256xf32> to vector<8x256xbf16>
    %cst = arith.constant dense<0.000000e+00> : vector<8x256xf32>
    %6 = tpu.matmul %4, %5, %cst {dimension_numbers = #tpu.dot_dimension_numbers<[1], [0], [0], [1], [0, 0, 1, 1], [], []>} : vector<8x8xbf16>, vector<8x256xbf16>, vector<8x256xf32> -> vector<8x256xf32>
    %c0_5 = arith.constant 0 : index
    %c0_6 = arith.constant 0 : index
    %c0_7 = arith.constant 0 : index
    %7 = vector.load %arg3[%c0_5, %c0_6, %c0_7] : memref<1x8x1xf32, #tpu.memory_space<vmem>>, vector<1x8x1xf32>
    %8 = vector.shape_cast %7 : vector<1x8x1xf32> to vector<8x1xf32>
    %9 = vector.broadcast %8 : vector<8x1xf32> to vector<8x256xf32>
    %10 = arith.addf %6, %9 : vector<8x256xf32>
    %11 = arith.addf %1, %10 : vector<8x256xf32>
    %c0_8 = arith.constant 0 : index
    %c0_9 = arith.constant 0 : index
    %c0_10 = arith.constant 0 : index
    %12 = vector.load %arg5[%c0_8, %c0_9, %c0_10] : memref<1x8x256xf32, #tpu.memory_space<vmem>>, vector<1x8x256xf32>
    %13 = vector.shape_cast %12 : vector<1x8x256xf32> to vector<8x256xf32>
    %14 = vector.shape_cast %11 : vector<8x256xf32> to vector<1x8x256xf32>
    tpu.vector_store %arg5[%c0_8, %c0_9, %c0_10], %14 {strides = array<i32>} : memref<1x8x256xf32, #tpu.memory_space<vmem>>, vector<1x8x256xf32>,
    return
  }
  func.func @transform_0(%arg0: i32, %arg1: i32) -> (i32, i32, i32) {
    %c0_i32 = arith.constant 0 : i32
    %c0_i32_0 = arith.constant 0 : i32
    %c0_i32_1 = arith.constant 0 : i32
    return %arg0, %c0_i32, %c0_i32_0 : i32, i32, i32
  }
  func.func @transform_1(%arg0: i32, %arg1: i32) -> (i32, i32, i32) {
    %c0_i32 = arith.constant 0 : i32
    %c0_i32_0 = arith.constant 0 : i32
    %c0_i32_1 = arith.constant 0 : i32
    return %arg0, %c0_i32, %c0_i32_0 : i32, i32, i32
  }
  func.func @transform_2(%arg0: i32, %arg1: i32) -> (i32, i32, i32) {
    %c0_i32 = arith.constant 0 : i32
    %c0_i32_0 = arith.constant 0 : i32
    return %arg0, %c0_i32, %arg1 : i32, i32, i32
  }
  func.func @transform_3(%arg0: i32, %arg1: i32) -> (i32, i32, i32) {
    %c0_i32 = arith.constant 0 : i32
    %c0_i32_0 = arith.constant 0 : i32
    return %arg0, %c0_i32, %arg1 : i32, i32, i32
  }
}

</mosaic_0001>

<bundles_post_ra>
// kernel: custom-call.2
= control target key start
LH: loop header
LB: loop body
LE: loop exit
PB: predicated region body
PF: predicated region fallthrough
CT: control target
= control target key end

     0   :  { %s1740_s30 = smov 0   ;;  %s1742_s10 = smov 0   ;;  %s2067_s0 = inlined_call_operand.vmem [shape: f32[2,4,4], index: 0, kind: input, shape index: {}]   ;;  %s2068_s1 = inlined_call_operand.vmem [shape: f32[2,4,4], index: 1, kind: input, shape index: {}]   ;;  %s2069_s2 = inlined_call_operand.vmem [shape: f32[2,4,4], index: 2, kind: input, shape index: {}]   ;;  %s2070_s3 = inlined_call_operand.vmem [shape: f32[2,4,4], index: 3, kind: input, shape index: {}]   ;;  %s2071_s4 = inlined_call_operand.vmem [shape: f32[2,4], index: 4, kind: output, shape index: {0}]   ;;  %s2072_s5 = inlined_call_operand.vmem [shape: f32[2,4], index: 5, kind: output, shape index: {1}]   ;;  %s2073_s6 = inlined_call_operand.vmem [shape: f32[2,4,4], index: 6, kind: output, shape index: {2}]   ;;  %s2074_s7 = inlined_call_operand.vmem [shape: f32[2,4,4], index: 7, kind: output, shape index: {3}]   ;;  %s2075_s8 = inlined_call_operand.vmem [shape: f32[2,4,4], index: 8, kind: output, shape index: {4}]   ;;  %s2076_s9 = inlined_call_operand.vmem [shape: f32[2,4,4], index: 9, kind: output, shape index: {5}]  }
   0x1   :  { %s1744_s11 = smov 0  }
   0x2 LB: > { %s1756_s12 = sadd.s32 4294967295, %s1677_s11   ;;  %s1759_s13 = sadd.s32 1, %s1677_s11   ;;  %s1677_s11 = sphi %s1744_s11, %s2095_s11   ;;  %s1673_s10 = sphi %s1742_s10, %s2094_s10   ;;  %s1669_s30 = sphi %s1740_s30, %s2093_s30  }
   0x3   : > { %s20_s14 = sshrl.u32 %s1677_s11, 3  ;;  %s21_s15 = sshrl.u32 %s1759_s13, 3 }
   0x4   : > { %s22_s16 = ssub.s32 %s20_s14, %s21_s15  ;;  %s25_s17 = sadd.s32 1, %s1673_s10 }
   0x5   : > { %p23_p0 = scmp.eq.s32.totalorder %s22_s16, 0  ;;  %p35_p1 = scmp.ne.s32.totalorder %s1673_s10, %s1669_s30 }
   0x6   : > { %p36_p2 = scmp.eq.s32.totalorder %s1756_s12, 1  ;;  %p1538_p4 = scmp.ge.s32.totalorder %s1677_s11, 2 }
   0x7   : > { %s1768_s18 = scalar_select %p23_p0, %s1673_s10, %s25_s17  }
   0x8   : > { %p1770_p3 = por %p36_p2, %p35_p1  ;;  %86 = sbr.rel (%p1538_p4) target bundleno = 18 (0x12), region = 16 }
   0x9   : > { %2077 = sst [smem:[#allocation33_spill]] %s1768_s18  ;;  %s88_s20 = sand.u32 (!%p1538_p4), 1, %s1677_s11  }
   0xa   : > { %s1540_s21 = sshll.u32 (!%p1538_p4), %s1677_s11, 2  ;;  %s1539_s22 = sshll.u32 (!%p1538_p4), %s88_s20, 2 }
   0xb   : > { %s92_s25 = scalar_lea.vmem (!%p1538_p4), %s2067_s0, %s1540_s21  ;;  %s90_s26 = scalar_lea.vmem (!%p1538_p4), [#allocation1], %s1539_s22 }
   0xc   : > { %s131_s29 = scalar_lea.vmem (!%p1538_p4), %s2068_s1, %s1540_s21  ;;  %s170_s16 = scalar_lea.vmem (!%p1538_p4), %s2069_s2, %s1540_s21 }
   0xd   : > { %v109_v0 = vld [vmem:[%s92_s25] sm:$0xf]  ;;  %s129_s17 = scalar_lea.vmem [#allocation3], %s1539_s22  ;;  %s209_s23 = scalar_lea.vmem %s2070_s3, %s1540_s21 }
   0xe   : > { %110 = vst [vmem:[%s90_s26] sm:$0xf] %v109_v0  ;;  %v148_v1 = vld [vmem:[%s131_s29] sm:$0xf]  ;;  %s168_s24 = scalar_lea.vmem [#allocation5], %s1539_s22  ;;  %s207_s25 = scalar_lea.vmem [#allocation7], %s1539_s22 }
   0xf   : > { %149 = vst [vmem:[%s129_s17] sm:$0xf] %v148_v1  ;;  %v187_v2 = vld [vmem:[%s170_s16] sm:$0xf] }
  0x10   : > { %188 = vst [vmem:[%s168_s24] sm:$0xf] %v187_v2  ;;  %v226_v3 = vld [vmem:[%s209_s23] sm:$0xf] }
  0x11   : > { %227 = vst [vmem:[%s207_s25] sm:$0xf] %v226_v3 }
  0x12 PF: > { %p1547_p5 = scmp.ge.s32.totalorder %s1677_s11, 1  ;;  %p244_p6 = scmp.lt.s32.totalorder %s1677_s11, 3 }
  0x14   : > { %p245_p7 = pnand %p1547_p5, %p244_p6 }
  0x16   : > { %248 = sbr.rel (%p245_p7) target bundleno = 994 (0x3e2), region = 140 }
  0x1b   : > { %s267_s26 = sand.u32 1, %s1756_s12   ;;  %s285_s27 = sand.u32 1, %s1669_s30   ;;  %v349_v4 = vlaneseq  ;;  %v1687_v5 = vmov 0.0  }
  0x1c   : > { %s1793_s28 = sshll.u32 %s267_s26, 2  ;;  %s1795_s18 = sshll.u32 %s285_s27, 1  ;;  %344 = vst [vmem:[#allocation12] sm:$0xff] %v1687_v5  ;;  %345 = vst [vmem:[#allocation14] sm:$0xff] %v1687_v5 }
  0x1d   : > { %346 = vst [vmem:[#allocation16] sm:$0xff] %v1687_v5  ;;  %347 = vst [vmem:[#allocation18] sm:$0xff] %v1687_v5  ;;  %v1797_v6 = vand.u32 127, %v349_v4  ;;  %v1799_v7 = vshrl.u32 %v349_v4, 7  ;;  %s269_s11 = scalar_lea.vmem [#allocation1], %s1793_s28  ;;  %s273_s30 = scalar_lea.vmem [#allocation3], %s1793_s28 }
  0x1e   : > { %v313_v8 = vld [vmem:[%s269_s11] sm:$0xf]  ;;  %v318_v9 = vld [vmem:[%s273_s30] sm:$0xf]  ;;  %s277_s21 = scalar_lea.vmem [#allocation5], %s1793_s28  ;;  %s281_s22 = scalar_lea.vmem [#allocation7], %s1793_s28 }
  0x1f   : > { %314 = vst [vmem:[#allocation0] sm:$0xf] %v313_v8  ;;  %319 = vst [vmem:[#allocation2] sm:$0xf] %v318_v9  ;;  %v323_v10 = vld [vmem:[%s277_s21] sm:$0xf]  ;;  %v351_v6 = vmov %v1797_v6  ;;  %v354_v7 = vmov %v1799_v7 }
  0x20   : > { %v328_v11 = vld [vmem:[%s281_s22] sm:$0xf]  ;;  %324 = vst [vmem:[#allocation4] sm:$0xf] %v323_v10  ;;  %v364_v6 = vmov %v1797_v6  ;;  %v367_v7 = vmov %v1799_v7  ;;  %s332_s29 = smov [#allocation20]  ;;  %s335_s14 = smov [#allocation21]  ;;  %vm358_vm0 = vcmp.eq.s32.totalorder %v354_v7, %v351_v6 }
  0x21   : > { %329 = vst [vmem:[#allocation6] sm:$0xf] %v328_v11  ;;  %vm371_vm1 = vcmp.eq.s32.totalorder %v367_v7, %v364_v6  ;;  %s348_s15 = smov [#allocation12]  ;;  %s361_s16 = smov [#allocation18]  ;;  %vm1427_vm2 = vcmp.lt.s32.totalorder %v1797_v6, 4  ;;  %v1419_v6 = vmov %v1797_v6  ;;  %v1422_v7 = vmov %v1799_v7 }
  0x22   : > { %s338_s17 = smov [#allocation22]  ;;  %s341_s20 = smov [#allocation23]  ;;  %vm1432_vm3 = vcmp.eq.s32.totalorder %v1422_v7, %v1419_v6  ;;  %v1470_v6 = vmov %v1797_v6  ;;  %v1439_v7 = vmov %v1799_v7 }
  0x23   : > { %v355_v12 = vld [vmem:[%s348_s15] sm:$0xf]  ;;  %s1423_s30 = smov [#allocation20]  ;;  %s1440_s21 = smov [#allocation21]  ;;  %v1436_v6 = vmov %v1797_v6  ;;  %v1473_v7 = vmov %v1799_v7 }
  0x24   : > { %v368_v13 = vld [vmem:[%s361_s16] sm:$0xf]  ;;  %v359_v16 = vsel %vm358_vm0, 1.0, %v355_v12  ;;  %s1457_s22 = smov [#allocation22]  ;;  %v1453_v6 = vmov %v1797_v6  ;;  %v1456_v7 = vmov %v1799_v7  ;;  %vm1483_vm4 = vcmp.eq.s32.totalorder %v1473_v7, %v1470_v6 }
  0x25   : > { %v372_v17 = vsel %vm371_vm1, 1.0, %v368_v13  ;;  %360 = vst [vmem:[%s348_s15] sm:$0xf] %v359_v16 }
  0x26   : > { %v333_v14 = vld [vmem:[#allocation0] sm:$0xff]  ;;  %v336_v15 = vld [vmem:[#allocation2] sm:$0xff]  ;;  %373 = vst [vmem:[%s361_s16] sm:$0xf] %v372_v17 }
  0x27   : > { %334 = vst [vmem:[%s332_s29] sm:$0xff] %v333_v14  ;;  %337 = vst [vmem:[%s335_s14] sm:$0xff] %v336_v15  ;;  %v339_v18 = vld [vmem:[#allocation4] sm:$0xff]  ;;  %s1474_s29 = smov [#allocation23] }
  0x28   : > { %v342_v19 = vld [vmem:[#allocation6] sm:$0xff]  ;;  %340 = vst [vmem:[%s338_s17] sm:$0xff] %v339_v18 }
  0x29   : > { %343 = vst [vmem:[%s341_s20] sm:$0xff] %v342_v19 }
  0x2e   : > { %v1429_v20 = vld [vmem:[%s1423_s30] sm:$0xf] }
  0x2f   : > { %v1446_v21 = vld [vmem:[%s1440_s21] sm:$0xf]  ;;  %v1430_v22 = vsel %vm1427_vm2, %v1429_v20, 0.0 }
  0x30   : > { %v1447_v23 = vsel %vm1427_vm2, %v1446_v21, 0.0  ;;  %v1463_v24 = vld [vmem:[%s1457_s22] sm:$0xf]  ;;  %v1431_v26 = vmul.f32 %v1430_v22, %v1430_v22 }
  0x31   : > { %v1480_v25 = vld [vmem:[%s1474_s29] sm:$0xf]  ;;  %v1448_v27 = vmul.f32 %v1447_v23, %v1447_v23  ;;  %v1464_v28 = vsel %vm1427_vm2, %v1463_v24, 0.0 }
  0x32   : > { %v1481_v29 = vsel %vm1427_vm2, %v1480_v25, 0.0  ;;  %v1465_v30 = vmul.f32 %v1464_v28, %v1464_v28  ;;  %v1433_v33 = vsel %vm1432_vm3, 0.0, %v1431_v26 }
  0x33   : > { %v1450_v31 = vadd.f32 %v1448_v27, %v1431_v26  ;;  %v1482_v32 = vmul.f32 %v1481_v29, %v1481_v29  ;;  %v1449_v34 = vadd.f32 %v1448_v27, %v1433_v33 }
  0x35   : > { %v1467_v35 = vadd.f32 %v1465_v30, %v1450_v31  ;;  %v1466_v36 = vadd.f32 %v1465_v30, %v1449_v34  ;;  %v1484_v37 = vsel %vm1483_vm4, 0.0, %v1482_v32 }
  0x37   : > { %v1486_v38 = vadd.f32 %v1482_v32, %v1467_v35  ;;  %v1485_v39 = vadd.f32 %v1484_v37, %v1466_v36 }
  0x39   : > { %1487 = vadd.xlane.f32.xlu0 %v1486_v38 }
  0x3d   : > { %1495 = vadd.xlane.f32.xlu0 %v1485_v39 }
  0xc2   : > { %v1488_v40 = vpop.xlane.xlu0 %1487 }
  0xc3   : > { %v1489_v41 = vrot.slane %v1488_v40, 4 }
  0xc5   : > { %v1490_v42 = vadd.f32 %v1489_v41, %v1488_v40 }
  0xc6   : > { %v1496_v43 = vpop.xlane.xlu0 %1495 }
  0xc7   : > { %v1491_v44 = vrot.slane %v1490_v42, 2  ;;  %v1497_v45 = vrot.slane %v1496_v43, 4 }
  0xc9   : > { %v1498_v46 = vadd.f32 %v1497_v45, %v1496_v43  ;;  %v1492_v47 = vadd.f32 %v1491_v44, %v1490_v42 }
  0xcb   : > { %v1499_v48 = vrot.slane %v1498_v46, 2  ;;  %v1493_v50 = vrot.slane %v1492_v47, 1 }
  0xcd   : > { %v1500_v49 = vadd.f32 %v1499_v48, %v1498_v46  ;;  %v1494_v53 = vadd.f32 %v1493_v50, %v1492_v47 }
  0xcf   : > { %v1501_v51 = vrot.slane %v1500_v49, 1 }
  0xd1   : > { %v1502_v52 = vadd.f32 %v1501_v51, %v1500_v49 }
  0xd3   : > { %1588 = vpush %v1502_v52 }
  0xd4   : > { %1590 = vpush %v1494_v53 }
 0x104   : > { %s1589_s14 = spop %1588 }
 0x105   : > { %s1591_s15 = spop %1590 }
 0x106   : > { %s1505_s16 = smul.f32 1e-10, %s1591_s15 }
 0x108   : > { %p1506_p8 = scmp.le.f32.partialorder %s1589_s14, %s1505_s16 }
 0x109   : > { %s1833_s17 = smov (!%p1506_p8), 0  }
 0x10a   : > { %1509 = sbr.rel (%p1506_p8) target bundleno = 948 (0x3b4), region = 467 }
 0x10f LB: >> { %s1838_s20 = smov 0   ;;  %s1681_s17 = sphi %s1833_s17, %s2079_s17  }
 0x110 LB: >>> { %s478_s30 = smov [#allocation20]  ;;  %v482_v6 = vmov %v1797_v6  ;;  %v485_v7 = vmov %v1799_v7  ;;  %s498_s21 = smov [#allocation21]  ;;  %vm801_vm14 = vcmp.eq.s32.totalorder %v1799_v7, 0  ;;  %vm813_vm15 = vcmp.eq.s32.totalorder %v1799_v7, 3  ;;  %s1685_s20 = sphi %s1838_s20, %s477_s20  }
 0x111   : >>> { %v502_v6 = vmov %v1797_v6  ;;  %v505_v7 = vmov %v1799_v7  ;;  %v486_v54 = vld [vmem:[%s478_s30] sm:$0xf]  ;;  %vm489_vm5 = vcmp.eq.s32.totalorder %v485_v7, %v482_v6  ;;  %s518_s22 = smov [#allocation23]  ;;  %s479_s29 = smov [#allocation24] }
 0x112   : >>> { %vm509_vm6 = vcmp.eq.s32.totalorder %v505_v7, %v502_v6  ;;  %v522_v6 = vmov %v1797_v6  ;;  %v525_v7 = vmov %v1799_v7  ;;  %v490_v55 = vsel %vm489_vm5, %v486_v54, 0.0  ;;  %v506_v56 = vld [vmem:[%s498_s21] sm:$0xf]  ;;  %s499_s14 = smov [#allocation25]  ;;  %s519_s15 = smov [#allocation26] }
 0x113   : >>> { %vm529_vm7 = vcmp.eq.s32.totalorder %v525_v7, %v522_v6  ;;  %v491_v57 = vrot.slane %v490_v55, 4  ;;  %v510_v58 = vsel %vm509_vm6, %v506_v56, 0.0  ;;  %v526_v59 = vld [vmem:[%s518_s22] sm:$0xf]  ;;  %s542_s16 = smov [#allocation25]  ;;  %s540_s30 = smov [#allocation24]  ;;  %v591_v6 = vmov %v1797_v6 }
 0x114   : >>> { %v511_v60 = vrot.slane %v510_v58, 4  ;;  %v530_v61 = vsel %vm529_vm7, %v526_v59, 0.0  ;;  %s544_s21 = smov [#allocation26]  ;;  %s579_s22 = smov [#allocation27]  ;;  %v594_v7 = vmov %v1799_v7  ;;  %v606_v6 = vmov %v1797_v6 }
 0x115   : >>> { %v492_v62 = vadd.f32 %v491_v57, %v490_v55  ;;  %v531_v63 = vrot.slane %v530_v61, 4  ;;  %v609_v7 = vmov %v1799_v7  ;;  %vm596_vm12 = vcmp.eq.s32.totalorder %v594_v7, %v591_v6  ;;  %s1857_s24 = smov [#allocation22]  ;;  %s1863_s23 = smov [#allocation14] }
 0x116   : >>> { %v512_v0 = vadd.f32 %v511_v60, %v510_v58  ;;  %vm611_vm13 = vcmp.eq.s32.totalorder %v609_v7, %v606_v6  ;;  %s841_s11 = smov [#allocation31]  ;;  %s1869_s27 = smov [#allocation18]  ;;  %v627_v55 = vld [vmem:[%s1857_s24] sm:$0xf]  ;;  %v704_v6 = vmov %v1797_v6  ;;  %v707_v7 = vmov %v1799_v7 }
 0x117   : >>> { %v493_v1 = vrot.slane %v492_v62, 2  ;;  %v532_v2 = vadd.f32 %v531_v63, %v530_v61  ;;  %v850_v58 = vld [vmem:[%s1863_s23] sm:$0xf]  ;;  %s619_s26 = smov [#allocation32]  ;;  %s843_s25 = smov [#allocation32]  ;;  %v718_v6 = vmov %v1797_v6  ;;  %v721_v7 = vmov %v1799_v7 }
 0x118   : >>> { %v513_v3 = vrot.slane %v512_v0, 2  ;;  %v852_v61 = vld [vmem:[%s1869_s27] sm:$0xf]  ;;  %vm711_vm0 = vcmp.eq.s32.totalorder %v707_v7, %v704_v6  ;;  %v677_v6 = vmov %v1797_v6  ;;  %v680_v7 = vmov %v1799_v7  ;;  %s477_s20 = sadd.s32 1, %s1685_s20  }
 0x119   : >>> { %v494_v4 = vadd.f32 %v493_v1, %v492_v62  ;;  %v533_v5 = vrot.slane %v532_v2, 2  ;;  %v691_v6 = vmov %v1797_v6  ;;  %v694_v7 = vmov %v1799_v7  ;;  %p474_p9 = scmp.ge.s32.totalorder %s477_s20, 7  }
 0x11a   : >>> { %v514_v8 = vadd.f32 %v513_v3, %v512_v0  ;;  %vm726_vm1 = vcmp.eq.s32.totalorder %v721_v7, %v718_v6  ;;  %vm685_vm3 = vcmp.eq.s32.totalorder %v680_v7, %v677_v6  ;;  %vm698_vm4 = vcmp.eq.s32.totalorder %v694_v7, %v691_v6 }
 0x11b   : >>> { %v495_v9 = vrot.slane %v494_v4, 1  ;;  %v534_v10 = vadd.f32 %v533_v5, %v532_v2  ;;  %vm740_vm5 = vcmp.eq.s32.totalorder %v1797_v6, 0  ;;  %vm744_vm6 = vcmp.eq.s32.totalorder %v1797_v6, 1 }
 0x11c   : >>> { %v515_v11 = vrot.slane %v514_v8, 1  ;;  %vm757_vm7 = vcmp.eq.s32.totalorder %v1797_v6, 3  ;;  %v378_v6 = vmov (%p474_p9), %v1797_v6  ;;  %v381_v7 = vmov (%p474_p9), %v1799_v7 }
 0x11d   : >>> { %v496_v12 = vadd.f32 %v495_v9, %v494_v4  ;;  %v535_v13 = vrot.slane %v534_v10, 1  ;;  %v431_v6 = vmov (%p474_p9), %v1797_v6 }
 0x11e   : >>> { %v516_v14 = vadd.f32 %v515_v11, %v514_v8 }
 0x11f   : >>> { %497 = vst [vmem:[%s479_s29] sm:$0x1] %v496_v12  ;;  %v536_v15 = vadd.f32 %v535_v13, %v534_v10  ;;  %s581_s29 = smov [#allocation28] }
 0x120   : >>> { %517 = vst [vmem:[%s499_s14] sm:$0x1] %v516_v14  ;;  %s538_s14 = smov [#allocation29] }
 0x121   : >>> { %537 = vst [vmem:[%s519_s15] sm:$0x1] %v536_v15  ;;  %s539_s15 = smov [#allocation30]  ;;  %s583_s14 = smov %s538_s14 }
 0x122   : >>> { %s585_s15 = smov %s539_s15 }
 0x126   : >>> { %v541_v18 = vld [vmem:[%s540_s30] sm:$0xff]  ;;  %s602_s30 = smov [#allocation30] }
 0x127   : >>> { %v543_v16 = vld [vmem:[%s542_s16] sm:$0xff]  ;;  %v564_v33 = vand.u32 2147483647, %v541_v18  ;;  %s587_s16 = smov [#allocation29] }
 0x128   : >>> { %v547_v17 = vmul.f32 2.0, %v543_v16  ;;  %v545_v19 = vld [vmem:[%s544_s21] sm:$0xff]  ;;  %v565_v36 = vand.u32 2147483647, %v543_v16  ;;  %s600_s21 = smov [#allocation31] }
 0x129   : >>> { %v546_v20 = vsub.f32 %v545_v19, %v541_v18  ;;  %v566_v34 = vand.u32 2147483647, %v545_v19 }
 0x12a   : >>> { %1639 = vrcp.f32 %v547_v17 }
 0x12b   : >>> { %v567_v35 = vmin.f32 %v564_v33, %v566_v34 }
 0x12d   : >>> { %v568_v37 = vmul.f32 1.1920929e-08, %v567_v35 }
 0x12f   : >>> { %vm569_vm11 = vcmp.le.f32.partialorder %v565_v36, %v568_v37 }
 0x137   : >>> { %v1640_v21 = vpop.eup %1639 }
 0x138   : >>> { %v549_v22 = vmul.f32 %v1640_v21, %v546_v20 }
 0x13a   : >>> { %v551_v23 = vmul.f32 %v549_v22, %v549_v22  ;;  %vm550_vm10 = vcmp.ge.f32.partialorder %v549_v22, 0.0 }
 0x13c   : >>> { %v552_v24 = vadd.f32 1.0, %v551_v23 }
 0x13e   : >>> { %1641 = vrsqrt.f32 %v552_v24  ;;  %vm555_vm8 = vcmp.eq.f32.partialorder %v552_v24, inf  ;;  %v558_v26 = vand.u32 2147483648, %v552_v24  ;;  %vm557_vm9 = vcmp.eq.f32.partialorder %v552_v24, 0.0 }
 0x14b   : >>> { %v1642_v25 = vpop.eup %1641 }
 0x14c   : >>> { %v554_v27 = vmul.f32 %v1642_v25, %v552_v24 }
 0x14e   : >>> { %v556_v28 = vsel %vm555_vm8, %v552_v24, %v554_v27  ;;  %vm393_vm8 = vcmp.eq.s32.totalorder (%p474_p9), %v381_v7, %v378_v6  ;;  %v434_v7 = vmov (%p474_p9), %v1799_v7  ;;  %v397_v6 = vmov (%p474_p9), %v1797_v6 }
 0x14f   : >>> { %v559_v29 = vsel %vm557_vm9, %v558_v26, %v556_v28  ;;  %v400_v7 = vmov (%p474_p9), %v1799_v7  ;;  %v414_v6 = vmov (%p474_p9), %v1797_v6  ;;  %vm446_vm9 = vcmp.eq.s32.totalorder (%p474_p9), %v434_v7, %v431_v6 }
 0x150   : >>> { %v560_v30 = vxor.u32 2147483648, %v559_v29  ;;  %v417_v7 = vmov (%p474_p9), %v1799_v7 }
 0x152   : >>> { %v561_v31 = vsel %vm550_vm10, %v559_v29, %v560_v30 }
 0x153   : >>> { %v562_v32 = vadd.f32 %v561_v31, %v549_v22 }
 0x155   : >>> { %1643 = vrcp.f32 %v562_v32 }
 0x162   : >>> { %v1644_v38 = vpop.eup %1643 }
 0x163   : >>> { %v570_v39 = vsel %vm569_vm11, 0.0, %v1644_v38 }
 0x164   : >>> { %v571_v40 = vmul.f32 %v570_v39, %v570_v39  ;;  %v575_v41 = vmul.f32 %v570_v39, %v543_v16 }
 0x166   : >>> { %v572_v42 = vadd.f32 1.0, %v571_v40  ;;  %v576_v43 = vsub.f32 %v541_v18, %v575_v41  ;;  %v578_v44 = vadd.f32 %v575_v41, %v545_v19 }
 0x168   : >>> { %1645 = vrsqrt.f32 %v572_v42  ;;  %580 = vst [vmem:[%s579_s22] sm:$0xff] %v576_v43  ;;  %582 = vst [vmem:[%s581_s29] sm:$0xff] %v578_v44  ;;  %s617_s22 = smov [#allocation31]  ;;  %s1853_s29 = smov [#allocation20] }
 0x169   : >>> { %v625_v53 = vld [vmem:[%s1853_s29] sm:$0xf] }
 0x175   : >>> { %v1646_v45 = vpop.eup %1645 }
 0x176   : >>> { %584 = vst [vmem:[%s583_s14] sm:$0xff] %v1646_v45  ;;  %v574_v46 = vmul.f32 %v1646_v45, %v570_v39  ;;  %s615_s14 = smov [#allocation32] }
 0x178   : >>> { %586 = vst [vmem:[%s585_s15] sm:$0xff] %v574_v46  ;;  %s1855_s15 = smov [#allocation21] }
 0x179   : >>> { %v626_v54 = vld [vmem:[%s1855_s15] sm:$0xf] }
 0x17d   : >>> { %v588_v47 = vld [vmem:[%s587_s16] ss:$0 sm:$0xff]  ;;  %s1859_s16 = smov [#allocation23] }
 0x17e   : >>> { %v597_v48 = vsel %vm596_vm12, %v588_v47, 0.0  ;;  %v628_v56 = vld [vmem:[%s1859_s16] sm:$0xf] }
 0x17f   : >>> { %598 = vadd.xlane.f32.xlu0 %v597_v48  ;;  %v603_v49 = vld [vmem:[%s602_s30] ss:$0 sm:$0xff]  ;;  %s1861_s30 = smov [#allocation12] }
 0x180   : >>> { %v612_v50 = vsel %vm611_vm13, %v603_v49, 0.0  ;;  %v849_v57 = vld [vmem:[%s1861_s30] sm:$0xf] }
 0x183   : >>> { %613 = vadd.xlane.f32.xlu0 %v612_v50 }
 0x208   : >>> { %v599_v51 = vpop.xlane.xlu0 %598 }
 0x209   : >>> { %601 = vst [vmem:[%s600_s21] sm:$0xff] %v599_v51  ;;  %s1865_s21 = smov [#allocation16] }
 0x20a   : >>> { %v851_v59 = vld [vmem:[%s1865_s21] sm:$0xf] }
 0x20c   : >>> { %v614_v52 = vpop.xlane.xlu0 %613 }
 0x20d   : >>> { %616 = vst [vmem:[%s615_s14] sm:$0xff] %v614_v52  ;;  %s1889_s14 = smov [#allocation23] }
 0x210   : >>> { %v618_v60 = vld [vmem:[%s617_s22] sm:$0xff]  ;;  %s1887_s22 = smov [#allocation22] }
 0x211   : >>> { %v842_v62 = vld [vmem:[%s841_s11] sm:$0xff]  ;;  %v629_v63 = vmul.f32 %v625_v53, %v618_v60  ;;  %v632_v0 = vmul.f32 %v626_v54, %v618_v60  ;;  %v636_v1 = vmul.f32 %v627_v55, %v618_v60  ;;  %v639_v2 = vmul.f32 %v628_v56, %v618_v60  ;;  %s1885_s11 = smov [#allocation12] }
 0x212   : >>> { %v853_v3 = vmul.f32 %v849_v57, %v842_v62  ;;  %v856_v4 = vmul.f32 %v850_v58, %v842_v62  ;;  %v860_v5 = vmul.f32 %v851_v59, %v842_v62  ;;  %v863_v8 = vmul.f32 %v852_v61, %v842_v62 }
 0x214   : >>> { %v620_v9 = vld [vmem:[%s619_s26] sm:$0xff]  ;;  %s647_s26 = smov [#allocation30] }
 0x215   : >>> { %v844_v10 = vld [vmem:[%s843_s25] sm:$0xff]  ;;  %v630_v11 = vmul.f32 %v627_v55, %v620_v9  ;;  %v633_v12 = vmul.f32 %v628_v56, %v620_v9  ;;  %v635_v13 = vmul.f32 %v625_v53, %v620_v9  ;;  %v638_v14 = vmul.f32 %v626_v54, %v620_v9  ;;  %s645_s25 = smov [#allocation29] }
 0x216   : >>> { %v854_v15 = vmul.f32 %v851_v59, %v844_v10  ;;  %v857_v16 = vmul.f32 %v852_v61, %v844_v10  ;;  %v859_v17 = vmul.f32 %v849_v57, %v844_v10  ;;  %v862_v18 = vmul.f32 %v850_v58, %v844_v10  ;;  %v646_v27 = vld [vmem:[%s645_s25] ss:$0 sm:$0xff]  ;;  %s674_s25 = smov [#allocation27] }
 0x217   : >>> { %v631_v19 = vsub.f32 %v629_v63, %v630_v11  ;;  %v634_v20 = vsub.f32 %v632_v0, %v633_v12  ;;  %v637_v21 = vadd.f32 %v636_v1, %v635_v13  ;;  %v640_v22 = vadd.f32 %v639_v2, %v638_v14  ;;  %v648_v28 = vld [vmem:[%s647_s26] ss:$0 sm:$0xff]  ;;  %s673_s26 = smov [#allocation20] }
 0x218   : >>> { %v855_v23 = vsub.f32 %v853_v3, %v854_v15  ;;  %v858_v24 = vsub.f32 %v856_v4, %v857_v16  ;;  %v861_v25 = vadd.f32 %v860_v5, %v859_v17  ;;  %v864_v26 = vadd.f32 %v863_v8, %v862_v18  ;;  %v681_v63 = vld [vmem:[%s674_s25] ss:$0 sm:$0xff]  ;;  %s917_s25 = sadd.s32 (%p474_p9), 1, %s1681_s17  }
 0x219   : >>> { %642 = vst [vmem:[%s1855_s15] sm:$0xf] %v634_v20  ;;  %644 = vst [vmem:[%s1859_s16] sm:$0xf] %v640_v22  ;;  %s1891_s15 = smov [#allocation20]  ;;  %s715_s16 = smov [#allocation28] }
 0x21a   : >>> { %641 = vst [vmem:[%s1853_s29] sm:$0xf] %v631_v19  ;;  %643 = vst [vmem:[%s1857_s24] sm:$0xf] %v637_v21  ;;  %s1893_s24 = smov [#allocation16]  ;;  %s1901_s29 = smov [#allocation21]  ;;  %v722_v59 = vld [vmem:[%s715_s16] ss:$0 sm:$0xff] }
 0x21b   : >>> { %865 = vst [vmem:[%s1861_s30] sm:$0xf] %v855_v23  ;;  %866 = vst [vmem:[%s1863_s23] sm:$0xf] %v858_v24  ;;  %s1895_s23 = smov [#allocation14]  ;;  %s701_s30 = smov [#allocation22] }
 0x21c   : >>> { %867 = vst [vmem:[%s1865_s21] sm:$0xf] %v861_v25  ;;  %868 = vst [vmem:[%s1869_s27] sm:$0xf] %v864_v26  ;;  %s1899_s27 = smov [#allocation18]  ;;  %s714_s21 = smov [#allocation23] }
 0x21d   : >>> { %s817_s16 = smov [#allocation21]  ;;  %p470_p10 = scmp.ge.s32.totalorder (%p474_p9), %s917_s25, 15 }
 0x21e   : >> { %s2079_s17 = smov (%p474_p9), %s917_s25 }
 0x220   : >>> { %v656_v30 = vld [vmem:[%s1889_s14] sm:$0xf] }
 0x221   : >>> { %v655_v29 = vld [vmem:[%s1887_s22] sm:$0xf]  ;;  %v664_v36 = vmul.f32 %v656_v30, %v648_v28  ;;  %v667_v42 = vmul.f32 %v656_v30, %v646_v27 }
 0x222   : >>> { %v653_v31 = vld [vmem:[%s1891_s15] sm:$0xf]  ;;  %v663_v35 = vmul.f32 %v655_v29, %v646_v27  ;;  %v666_v37 = vmul.f32 %v655_v29, %v648_v28 }
 0x223   : >>> { %v871_v32 = vld [vmem:[%s1885_s11] ss:$0 sm:$0xff]  ;;  %v1567_v34 = vld [vmem:[%s1885_s11 + $0x3] ss:$0 sm:$0xff]  ;;  %v657_v48 = vmul.f32 %v653_v31, %v646_v27  ;;  %v660_v49 = vmul.f32 %v653_v31, %v648_v28 }
 0x224   : >>> { %v1566_v33 = vld [vmem:[%s1885_s11 - $0x1] sm:$0xe]  ;;  %v1571_v45 = vld [vmem:[%s1895_s23 + $0x3] ss:$0 sm:$0xff]  ;;  %v665_v47 = vsub.f32 %v663_v35, %v664_v36  ;;  %v668_v53 = vadd.f32 %v667_v42, %v666_v37 }
 0x225   : >>> { %v878_v38 = vsel %vm801_vm14, %v871_v32, %v1566_v33  ;;  %v882_v39 = vld [vmem:[%s1893_s24] ss:$0 sm:$0xff]  ;;  %v1569_v40 = vld [vmem:[%s1893_s24 + $0x1] sm:$0x7] }
 0x226   : >>> { %v895_v41 = vld [vmem:[%s1895_s23] ss:$0 sm:$0xff]  ;;  %881 = vst [vmem:[%s1885_s11] sm:$0xf] %v878_v38  ;;  %v890_v43 = vsel %vm813_vm15, %v1567_v34, %v1569_v40  ;;  %v1573_v51 = vld [vmem:[%s1899_s27 + $0x1] sm:$0x7]  ;;  %671 = vst [vmem:[%s1887_s22] sm:$0xf] %v665_v47 }
 0x227   : >>> { %v1570_v44 = vld [vmem:[%s1895_s23 - $0x1] sm:$0xe]  ;;  %1568 = vst [vmem:[%s1885_s11 + $0x1] sm:$0x1] %v882_v39  ;;  %892 = vst [vmem:[%s1893_s24] sm:$0xf] %v890_v43  ;;  %v914_v54 = vsel %vm813_vm15, %v1571_v45, %v1573_v51  ;;  %s688_s11 = smov [#allocation21] }
 0x228   : >>> { %v906_v46 = vld [vmem:[%s1899_s27] ss:$0 sm:$0xff]  ;;  %v902_v50 = vsel %vm801_vm14, %v895_v41, %v1570_v44  ;;  %672 = vst [vmem:[%s1889_s14] sm:$0xf] %v668_v53  ;;  %s1943_s22 = smov [#allocation22]  ;;  %s1688_s14 = smov 1  }
 0x229   : >>> { %v654_v52 = vld [vmem:[%s1901_s29] sm:$0xf]  ;;  %905 = vst [vmem:[%s1895_s23] sm:$0xf] %v902_v50  ;;  %916 = vst [vmem:[%s1899_s27] sm:$0xf] %v914_v54  ;;  %s730_s24 = smov [#allocation21]  ;;  %s1946_s27 = smov [#allocation23] }
 0x22a   : >>> { %v658_v55 = vmul.f32 %v654_v52, %v648_v28  ;;  %v661_v56 = vmul.f32 %v654_v52, %v646_v27  ;;  %1572 = vst [vmem:[%s1895_s23 + $0x1] sm:$0x1] %v906_v46  ;;  %s1689_s23 = smov 127  }
 0x22c   : >>> { %v659_v57 = vsub.f32 %v657_v48, %v658_v55  ;;  %v662_v58 = vadd.f32 %v661_v56, %v660_v49 }
 0x22d   : >>> { %v708_v60 = vld [vmem:[%s701_s30] sm:$0xf] }
 0x22e   : >>> { %669 = vst [vmem:[%s1891_s15] sm:$0xf] %v659_v57  ;;  %670 = vst [vmem:[%s1901_s29] sm:$0xf] %v662_v58  ;;  %v712_v61 = vsel %vm711_vm0, 0.0, %v708_v60  ;;  %s729_s15 = smov [#allocation20]  ;;  %s793_s29 = smov [#allocation20] }
 0x22f   : >>> { %v723_v62 = vld [vmem:[%s714_s21] sm:$0xf]  ;;  %713 = vst [vmem:[%s701_s30] sm:$0xf] %v712_v61  ;;  %s794_s30 = smov [#allocation22] }
 0x230   : >>> { %v727_v0 = vsel %vm726_vm1, %v722_v59, %v723_v62 }
 0x231   : >>> { %728 = vst [vmem:[%s714_s21] sm:$0xf] %v727_v0  ;;  %s818_s21 = smov [#allocation23] }
 0x235   : >>> { %v682_v1 = vld [vmem:[%s673_s26] sm:$0xf] }
 0x236   : >>> { %v695_v2 = vld [vmem:[%s688_s11] sm:$0xf]  ;;  %v686_v3 = vsel %vm685_vm3, %v681_v63, %v682_v1 }
 0x237   : >>> { %v699_v4 = vsel %vm698_vm4, 0.0, %v695_v2  ;;  %687 = vst [vmem:[%s673_s26] sm:$0xf] %v686_v3  ;;  %v767_v5 = vld [vmem:[%s1943_s22] sm:$0xf]  ;;  %s382_s26 = smov (%p474_p9), [#allocation20] }
 0x238   : >>> { %700 = vst [vmem:[%s688_s11] sm:$0xf] %v699_v4  ;;  %768 = vrot.lane.b32.xlu0 %v767_v5, %s1688_s14  ;;  %v763_v11 = vld [vmem:[%s1946_s27] sm:$0xf]  ;;  %s401_s11 = smov (%p474_p9), [#allocation21] }
 0x239   : >>> { %v784_v12 = vld [vmem:[%s1946_s27] sm:$0xf] }
 0x23a   : >>> { %v766_v30 = vld [vmem:[%s1943_s22] sm:$0xf] }
 0x23e   : >>> { %v735_v8 = vld [vmem:[%s729_s15] sm:$0xf] }
 0x23f   : >>> { %736 = vrot.lane.b32.xlu1 %v735_v8, %s1688_s14  ;;  %v731_v9 = vld [vmem:[%s730_s24] sm:$0xf] }
 0x240   : >>> { %v752_v10 = vld [vmem:[%s730_s24] sm:$0xf] }
 0x241   : >>> { %v734_v18 = vld [vmem:[%s729_s15] sm:$0xf] }
 0x243   : >>> { %732 = vrot.lane.b32.xlu1 %v731_v9, %s1688_s14 }
 0x247   : >>> { %753 = vrot.lane.b32.xlu1 %v752_v10, %s1689_s23 }
 0x24b   : >>> { %764 = vrot.lane.b32.xlu1 %v763_v11, %s1688_s14  ;;  %s435_s14 = smov (%p474_p9), [#allocation23] }
 0x24f   : >>> { %785 = vrot.lane.b32.xlu1 %v784_v12, %s1689_s23 }
 0x2aa   : >>> { %v769_v20 = vpop.permute.xlu0 %768 }
 0x2ab   : >>> { %v773_v22 = vsel %vm740_vm5, %v767_v5, %v769_v20 }
 0x2b1   : >>> { %v737_v13 = vpop.permute.xlu1 %736 }
 0x2b2   : >>> { %v741_v14 = vsel %vm740_vm5, %v735_v8, %v737_v13 }
 0x2b5   : >>> { %v733_v15 = vpop.permute.xlu1 %732 }
 0x2b6   : >>> { %v745_v16 = vsel %vm744_vm6, %v733_v15, %v741_v14 }
 0x2b7   : >>> { %v751_v17 = vsel %vm1427_vm2, %v745_v16, 0.0 }
 0x2b8   : >>> { %759 = vst [vmem:[%s729_s15] sm:$0xf] %v751_v17 }
 0x2b9   : >>> { %v754_v19 = vpop.permute.xlu1 %753 }
 0x2ba   : >>> { %v758_v21 = vsel %vm757_vm7, %v734_v18, %v754_v19 }
 0x2bb   : >>> { %760 = vst [vmem:[%s730_s24] sm:$0xf] %v758_v21 }
 0x2bd   : >>> { %v765_v23 = vpop.permute.xlu1 %764 }
 0x2be   : >>> { %v777_v24 = vsel %vm744_vm6, %v765_v23, %v773_v22 }
 0x2bf   : >>> { %v795_v25 = vld [vmem:[%s793_s29] ss:$0 sm:$0xff]  ;;  %v1559_v27 = vld [vmem:[%s793_s29 + $0x3] ss:$0 sm:$0xff]  ;;  %v783_v29 = vsel %vm1427_vm2, %v777_v24, 0.0 }
 0x2c0   : >>> { %v1558_v26 = vld [vmem:[%s793_s29 - $0x1] sm:$0xe]  ;;  %791 = vst [vmem:[%s1943_s22] sm:$0xf] %v783_v29  ;;  %s418_s22 = smov (%p474_p9), [#allocation22] }
 0x2c1   : >>> { %v802_v28 = vsel %vm801_vm14, %v795_v25, %v1558_v26  ;;  %v786_v31 = vpop.permute.xlu1 %785 }
 0x2c2   : >>> { %805 = vst [vmem:[%s793_s29] sm:$0xf] %v802_v28  ;;  %v819_v32 = vld [vmem:[%s817_s16] ss:$0 sm:$0xff]  ;;  %v1563_v34 = vld [vmem:[%s817_s16 + $0x3] ss:$0 sm:$0xff]  ;;  %v790_v35 = vsel %vm757_vm7, %v766_v30, %v786_v31 }
 0x2c3   : >>> { %v1562_v33 = vld [vmem:[%s817_s16 - $0x1] sm:$0xe]  ;;  %792 = vst [vmem:[%s1946_s27] sm:$0xf] %v790_v35 }
 0x2c4   : >>> { %v826_v36 = vsel %vm801_vm14, %v819_v32, %v1562_v33 }
 0x2c5   : >>> { %829 = vst [vmem:[%s817_s16] sm:$0xf] %v826_v36 }
 0x2c7   : >>> { %v806_v37 = vld [vmem:[%s794_s30] ss:$0 sm:$0xff]  ;;  %v1561_v38 = vld [vmem:[%s794_s30 + $0x1] sm:$0x7] }
 0x2c8   : >>> { %1560 = vst [vmem:[%s793_s29 + $0x1] sm:$0x1] %v806_v37  ;;  %v814_v39 = vsel %vm813_vm15, %v1559_v27, %v1561_v38 }
 0x2c9   : >>> { %816 = vst [vmem:[%s794_s30] sm:$0xf] %v814_v39 }
 0x2ca   : >>> { %v830_v40 = vld [vmem:[%s818_s21] ss:$0 sm:$0xff]  ;;  %v1565_v41 = vld [vmem:[%s818_s21 + $0x1] sm:$0x7] }
 0x2cb   : >>> { %1564 = vst [vmem:[%s817_s16 + $0x1] sm:$0x1] %v830_v40  ;;  %v838_v42 = vsel %vm813_vm15, %v1563_v34, %v1565_v41 }
 0x2cc   : >>> { %840 = vst [vmem:[%s818_s21] sm:$0xf] %v838_v42  ;;  %476 = sbr.rel (!%p474_p9) target bundleno = 272 (0x110), region = 462 }
 0x2cf   : >> { %v388_v43 = vld [vmem:[%s382_s26] sm:$0xf] (%p474_p9) }
 0x2d0   : >> { %v389_v45 = vsel (%p474_p9), %vm1427_vm2, %v388_v43, 0.0  ;;  %v424_v47 = vld [vmem:[%s418_s22] sm:$0xf] (%p474_p9) }
 0x2d1   : >> { %v390_v49 = vmul.f32 %v389_v45, %v389_v45  ;;  %v425_v51 = vsel %vm1427_vm2, %v424_v47, 0.0 }
 0x2d2   : >> { %v407_v44 = vld [vmem:[%s401_s11] sm:$0xf]  ;;  %v426_v53 = vmul.f32 %v425_v51, %v425_v51 }
 0x2d3   : >> { %v408_v46 = vsel %vm1427_vm2, %v407_v44, 0.0  ;;  %v441_v48 = vld [vmem:[%s435_s14] sm:$0xf]  ;;  %v394_v56 = vsel %vm393_vm8, 0.0, %v390_v49 }
 0x2d4   : >> { %v409_v50 = vmul.f32 %v408_v46, %v408_v46  ;;  %v442_v52 = vsel %vm1427_vm2, %v441_v48, 0.0 }
 0x2d5   : >> { %v443_v55 = vmul.f32 %v442_v52, %v442_v52 }
 0x2d6   : >> { %v411_v54 = vadd.f32 %v409_v50, %v390_v49  ;;  %v410_v57 = vadd.f32 %v409_v50, %v394_v56 }
 0x2d7   : >> { %v447_v60 = vsel %vm446_vm9, 0.0, %v443_v55 }
 0x2d8   : >> { %v428_v58 = vadd.f32 %v426_v53, %v411_v54  ;;  %v427_v59 = vadd.f32 %v426_v53, %v410_v57 }
 0x2da   : >> { %v449_v61 = vadd.f32 %v443_v55, %v428_v58  ;;  %v448_v62 = vadd.f32 %v447_v60, %v427_v59 }
 0x2dc   : >> { %450 = vadd.xlane.f32.xlu0 %v449_v61 }
 0x2e0   : >> { %458 = vadd.xlane.f32.xlu0 %v448_v62 }
 0x365   : >> { %v451_v63 = vpop.xlane.xlu0 %450 }
 0x366   : >> { %v452_v0 = vrot.slane %v451_v63, 4 }
 0x368   : >> { %v453_v1 = vadd.f32 %v452_v0, %v451_v63 }
 0x369   : >> { %v459_v2 = vpop.xlane.xlu0 %458 }
 0x36a   : >> { %v454_v3 = vrot.slane %v453_v1, 2  ;;  %v460_v4 = vrot.slane %v459_v2, 4 }
 0x36c   : >> { %v461_v5 = vadd.f32 %v460_v4, %v459_v2  ;;  %v455_v8 = vadd.f32 %v454_v3, %v453_v1 }
 0x36e   : >> { %v462_v9 = vrot.slane %v461_v5, 2  ;;  %v456_v11 = vrot.slane %v455_v8, 1 }
 0x370   : >> { %v463_v10 = vadd.f32 %v462_v9, %v461_v5  ;;  %v457_v14 = vadd.f32 %v456_v11, %v455_v8 }
 0x372   : >> { %v464_v12 = vrot.slane %v463_v10, 1 }
 0x374   : >> { %v465_v13 = vadd.f32 %v464_v12, %v463_v10 }
 0x376   : >> { %1592 = vpush %v465_v13 }
 0x377   : >> { %1594 = vpush %v457_v14 }
 0x3a7   : >> { %s1593_s20 = spop %1592 }
 0x3a8   : >> { %s1595_s15 = spop %1594 }
 0x3a9   : >> { %s468_s24 = smul.f32 1e-10, %s1595_s15 }
 0x3ab   : >> { %p469_p11 = scmp.le.f32.partialorder %s1593_s20, %s468_s24 }
 0x3ad   : >> { %p471_p12 = por %p470_p10, %p469_p11 }
 0x3af   : > { %919 = sbr.rel (!%p471_p12) target bundleno = 271 (0x10f), region = 473 }
 0x3b4 PF: > { %s924_s23 = smov [#allocation20]  ;;  %v928_v6 = vmov %v1797_v6  ;;  %v931_v7 = vmov %v1799_v7  ;;  %v984_v15 = vld [vmem:[#allocation12] sm:$0xf]  ;;  %v992_v16 = vld [vmem:[#allocation14] sm:$0xf]  ;;  %s2080_s17 = scalar_lea.vmem [#allocation13], %s1793_s28 }
 0x3b5   : > { %v948_v6 = vmov %v1797_v6  ;;  %v951_v7 = vmov %v1799_v7  ;;  %v932_v17 = vld [vmem:[%s924_s23] sm:$0xf]  ;;  %vm935_vm10 = vcmp.eq.s32.totalorder %v931_v7, %v928_v6  ;;  %987 = vst [vmem:[%s2080_s17] sm:$0xf] %v984_v15  ;;  %s2081_s27 = scalar_lea.vmem [#allocation15], %s1793_s28  ;;  %s944_s29 = smov [#allocation23] }
 0x3b6   : > { %vm955_vm11 = vcmp.eq.s32.totalorder %v951_v7, %v948_v6  ;;  %995 = vst [vmem:[%s2081_s27] sm:$0xf] %v992_v16  ;;  %v1000_v18 = vld [vmem:[#allocation16] sm:$0xf]  ;;  %v936_v19 = vsel %vm935_vm10, %v932_v17, 0.0  ;;  %s2082_s16 = scalar_lea.vmem [#allocation17], %s1793_s28  ;;  %s2083_s30 = scalar_lea.vmem [#allocation19], %s1793_s28 }
 0x3b7   : > { %1003 = vst [vmem:[%s2082_s16] sm:$0xf] %v1000_v18  ;;  %v1008_v20 = vld [vmem:[#allocation18] sm:$0xf]  ;;  %v937_v21 = vrot.slane %v936_v19, 4  ;;  %v952_v22 = vld [vmem:[%s944_s29] sm:$0xf] }
 0x3b8   : > { %1011 = vst [vmem:[%s2083_s30] sm:$0xf] %v1008_v20  ;;  %v956_v23 = vsel %vm955_vm11, %v952_v22, 0.0  ;;  %s920_s21 = sand.u32 7, %s1756_s12   ;;  %s2084_s11 = scalar_lea.vmem [#allocation9], %s1795_s18 }
 0x3b9   : > { %v938_v24 = vadd.f32 %v937_v21, %v936_v19  ;;  %v957_v25 = vrot.slane %v956_v23, 4  ;;  %s921_s25 = scalar_lea.vmem [#allocation8], %s920_s21  ;;  %s923_s26 = scalar_lea.vmem [#allocation10], %s920_s21 }
 0x3ba   : > { %s925_s25 = smov %s921_s25  ;;  %s945_s26 = smov %s923_s26 }
 0x3bb   : > { %v939_v26 = vrot.slane %v938_v24, 2  ;;  %v958_v6 = vadd.f32 %v957_v25, %v956_v23  ;;  %s2085_s22 = scalar_lea.vmem [#allocation11], %s1795_s18  ;;  %s1039_s14 = sshrl.u32 (%p1770_p3), %s1756_s12, 3 }
 0x3bc   : > { %s2086_s20 = scalar_lea.vmem (%p1770_p3), [#allocation9], %s1795_s18  ;;  %s1580_s15 = sshll.u32 (%p1770_p3), %s1039_s14, 1 }
 0x3bd   : > { %v940_v7 = vadd.f32 %v939_v26, %v938_v24  ;;  %v959_v27 = vrot.slane %v958_v6, 2  ;;  %s1041_s17 = scalar_lea.vmem (%p1770_p3), %s2071_s4, %s1580_s15 }
 0x3bf   : > { %v941_v28 = vrot.slane %v940_v7, 1  ;;  %v960_v29 = vadd.f32 %v959_v27, %v958_v6 }
 0x3c1   : > { %v942_v30 = vadd.f32 %v941_v28, %v940_v7  ;;  %v961_v31 = vrot.slane %v960_v29, 1 }
 0x3c3   : > { %943 = vst [vmem:[%s925_s25] sm:$0x1] %v942_v30  ;;  %v962_v32 = vadd.f32 %v961_v31, %v960_v29 }
 0x3c5   : > { %963 = vst [vmem:[%s945_s26] sm:$0x1] %v962_v32 }
 0x3c9   : > { %1038 = sbr.rel (!%p1770_p3) target bundleno = 980 (0x3d4), region = 158 }
 0x3ca   : > { %v968_v33 = vld [vmem:[#allocation8] sm:$0x3] }
 0x3cb   : > { %971 = vst [vmem:[%s2084_s11] sm:$0x3] %v968_v33 }
 0x3cc   : > { %v976_v34 = vld [vmem:[#allocation10] sm:$0x3] }
 0x3cd   : > { %979 = vst [vmem:[%s2085_s22] sm:$0x3] %v976_v34 }
 0x3d2   : > { %v1058_v35 = vld [vmem:[%s2086_s20] sm:$0x3] }
 0x3d3   : > { %1059 = vst [vmem:[%s1041_s17] sm:$0x3] %v1058_v35 }
 0x3d4 PF: > { %1077 = sbr.rel (!%p1770_p3) target bundleno = 988 (0x3dc), region = 192  ;;  %s1078_s27 = sshrl.u32 (%p1770_p3), %s1756_s12, 3 }
 0x3d5   : > { %s2087_s29 = scalar_lea.vmem (%p1770_p3), [#allocation11], %s1795_s18  ;;  %s1581_s16 = sshll.u32 (%p1770_p3), %s1078_s27, 1 }
 0x3d6   : > { %s1080_s25 = scalar_lea.vmem (%p1770_p3), %s2072_s5, %s1581_s16 }
 0x3da   : > { %v1097_v36 = vld [vmem:[%s2087_s29] sm:$0x3] }
 0x3db   : > { %1098 = vst [vmem:[%s1080_s25] sm:$0x3] %v1097_v36 }
 0x3dc PF: > { %s1582_s26 = sshll.u32 %s1756_s12, 2  ;;  %s2088_s19 = scalar_lea.vmem [#allocation13], %s1793_s28 }
 0x3dd   : > { %v1132_v37 = vld [vmem:[%s2088_s19] sm:$0xf]  ;;  %s2089_s11 = scalar_lea.vmem [#allocation15], %s1793_s28  ;;  %s1115_s14 = scalar_lea.vmem %s2073_s6, %s1582_s26 }
 0x3de   : > { %v1167_v38 = vld [vmem:[%s2089_s11] sm:$0xf]  ;;  %s1150_s24 = scalar_lea.vmem %s2074_s7, %s1582_s26  ;;  %s2090_s23 = scalar_lea.vmem [#allocation17], %s1793_s28  ;;  %1133 = vst [vmem:[%s1115_s14] sm:$0xf] %v1132_v37 }
 0x3df   : > { %v1202_v39 = vld [vmem:[%s2090_s23] sm:$0xf]  ;;  %s2091_s17 = scalar_lea.vmem [#allocation19], %s1793_s28  ;;  %1168 = vst [vmem:[%s1150_s24] sm:$0xf] %v1167_v38  ;;  %s1185_s29 = scalar_lea.vmem %s2075_s8, %s1582_s26 }
 0x3e0   : > { %v1237_v40 = vld [vmem:[%s2091_s17] sm:$0xf]  ;;  %s1220_s21 = scalar_lea.vmem %s2076_s9, %s1582_s26  ;;  %1203 = vst [vmem:[%s1185_s29] sm:$0xf] %v1202_v39 }
 0x3e1   : > { %1238 = vst [vmem:[%s1220_s21] sm:$0xf] %v1237_v40 }
 0x3e2 PF: > { %s2092_s25 = sld [smem:[#allocation33_spill]]  ;;  %p13_p13 = scmp.ge.s32.totalorder %s1759_s13, 4  }
 0x3e3   : > { %s2093_s30 = smov %s1673_s10  ;;  %s2095_s11 = smov %s1759_s13 }
 0x3e4   :  { %15 = sbr.rel (!%p13_p13) target bundleno = 2 (0x2), region = 484 }
 0x3e8   : > { %s2094_s10 = smov %s2092_s25 }

// kernel: sapca_block_v3.2
= control target key start
LH: loop header
LB: loop body
LE: loop exit
PB: predicated region body
PF: predicated region fallthrough
CT: control target
= control target key end

     0   :  { %s447_s9 = smov 0   ;;  %s449_s10 = smov 0   ;;  %s485_s0 = inlined_call_operand.vmem [shape: f32[2,8,256], index: 0, kind: input, shape index: {}]   ;;  %s486_s1 = inlined_call_operand.vmem [shape: f32[2,8,8], index: 1, kind: output, shape index: {0}]   ;;  %s487_s2 = inlined_call_operand.vmem [shape: f32[2,8,1], index: 2, kind: output, shape index: {1}]  }
   0x1   :  { %s451_s11 = smov 0  }
   0x2 LB: > { %s25_s12 = sadd.s32 1, %s425_s10  ;;  %p374_p0 = scmp.ge.s32.totalorder %s429_s11, 1  ;;  %s429_s11 = sphi %s451_s11, %s13_s11   ;;  %s425_s10 = sphi %s449_s10, %s489_s10   ;;  %s421_s9 = sphi %s447_s9, %s488_s9  }
   0x3   : > { %p27_p1 = scmp.ge.s32.totalorder %s25_s12, 2  ;;  %p134_p2 = scmp.lt.s32.totalorder %s429_s11, 3 }
   0x5   : > { %s491_s12 = smov (%p27_p1, %s25_s12), 0  ;;  %p135_p3 = pnand %p374_p0, %p134_p2 }
   0x6   : > { %p164_p4 = scmp.lt.s32.totalorder (!%p135_p3), %s421_s9, 1 }
   0x7   : > { %138 = sbr.rel (%p135_p3) target bundleno = 216 (0xd8), region = 24 }
   0xc   : > { %s493_s9 = smov (!%p164_p4, %s421_s9), 1  ;;  %vm185_vm0 = vcmask 64512   ;;  %v431_v2 = vmov 0.0   ;;  %vm187_vm1 = vcmask 7168  }
   0xd   : > { %s381_s13 = sshll.u32 %s493_s9, 4  ;;  %s377_s14 = sshll.u32 %s493_s9, 3 }
   0xe   : > { %s171_s17 = scalar_lea.vmem %s485_s0, %s381_s13  ;;  %s176_s20 = scalar_lea.vmem %s486_s1, %s377_s14 }
   0xf   : > { %v190_v0 = vld [vmem:[%s171_s17 + $0x8] sm:$0xff]  ;;  %v189_v1 = vld [vmem:[%s171_s17] sm:$0xff]  ;;  %186 = vst.msk [vmem:[%s176_s20] sm:$0xff] %vm185_vm0, %v431_v2  ;;  %s180_s23 = scalar_lea.vmem %s487_s2, %s377_s14 }
  0x10   : > { %222 = vmatprep.subr.mxu0 %v190_v0  ;;  %256 = vmatprep.mubr.f32.mxu0 %v190_v0  ;;  %v266_v3 = vadd.f32 %v190_v0, %v189_v1  ;;  %188 = vst.msk [vmem:[%s180_s23] sm:$0xff] %vm187_vm1, %v431_v2 }
  0x11   : > { %223 = vmatpush1.xpose.msra.mxu0 %v189_v1 }
  0x12   : > { %267 = vadd.xlane.f32.xlu0 %v266_v3 }
  0x14   : > { %257 = vmatmul.mubr.f32.vlgmr.msra.gmra.mxu0 %v189_v1 }
  0x16   : > { %v191_v7 = vld [vmem:[%s176_s20] sm:$0xff] }
  0x17   : > { %v265_v4 = vld [vmem:[%s180_s23] sm:$0xff] }
  0x9b   : > { %v268_v5 = vpop.xlane.xlu0 %267 }
  0x9c   : > { %v269_v6 = vadd.f32 %v268_v5, %v265_v4 }
  0x9e   : > { %271 = vst.msk [vmem:[%s180_s23] sm:$0xff] %vm187_vm1, %v269_v6 }
  0xd4   : > { %v258_v8 = vpop.f32.mrf.mxu0 }
  0xd5   : > { %v262_v9 = vadd.f32 %v258_v8, %v191_v7 }
  0xd6   : > { %v260_v10 = vpop.f32.mrf.mxu0 }
  0xd7   : > { %264 = vst.msk [vmem:[%s176_s20] sm:$0xff] %vm185_vm0, %v262_v9 }
  0xd8 PF: > { %s13_s11 = sadd.s32 1, %s429_s11   ;;  %s488_s9 = smov %s425_s10 }
  0xd9   : > { %p10_p5 = scmp.ge.s32.totalorder %s13_s11, 4   ;;  %s489_s10 = smov %s491_s12 }
  0xdb   :  { %12 = sbr.rel (!%p10_p5) target bundleno = 2 (0x2), region = 70 }

// kernel: sapca_block_v3.3
= control target key start
LH: loop header
LB: loop body
LE: loop exit
PB: predicated region body
PF: predicated region fallthrough
CT: control target
= control target key end

     0   :  { %s512_s12 = smov 0   ;;  %s514_s13 = smov 0   ;;  %s551_s0 = inlined_call_operand.vmem [shape: f32[2,8,8], index: 0, kind: input, shape index: {}]   ;;  %s552_s1 = inlined_call_operand.vmem [shape: f32[2,8,1], index: 1, kind: input, shape index: {}]   ;;  %s553_s2 = inlined_call_operand.vmem [shape: f32[2,8,256], index: 2, kind: input, shape index: {}]   ;;  %s554_s3 = inlined_call_operand.vmem [shape: f32[2,8,256], index: 3, kind: output, shape index: {}]  }
   0x1   :  { %s516_s14 = smov 0  }
   0x2 LB: > { %s25_s15 = sadd.s32 1, %s485_s13  ;;  %p428_p0 = scmp.ge.s32.totalorder %s489_s14, 1  ;;  %s489_s14 = sphi %s516_s14, %s13_s14   ;;  %s485_s13 = sphi %s514_s13, %s556_s13   ;;  %s481_s12 = sphi %s512_s12, %s555_s12  }
   0x3   : > { %p27_p1 = scmp.ge.s32.totalorder %s25_s15, 2  ;;  %p176_p2 = scmp.lt.s32.totalorder %s489_s14, 3 }
   0x5   : > { %s558_s15 = smov (%p27_p1, %s25_s15), 0  ;;  %p177_p3 = pnand %p428_p0, %p176_p2 }
   0x6   : > { %p216_p4 = scmp.lt.s32.totalorder (!%p177_p3), %s481_s12, 1 }
   0x7   : > { %180 = sbr.rel (%p177_p3) target bundleno = 222 (0xde), region = 32 }
   0xc   : > { %v491_v0 = vmov 0   ;;  %s560_s12 = smov (!%p216_p4, %s481_s12), 1  ;;  %vm261_vm0 = vcmask 1043456   ;;  %vm257_vm1 = vcmask 64512  }
   0xd   : > { %300 = vmatprep.mubr.bf16.mxu0 %v491_v0  ;;  %466 = vset.pattern.permute.xlu0 %v491_v0  ;;  %s429_s16 = sshll.u32 %s560_s12, 3  ;;  %s439_s17 = sshll.u32 %s560_s12, 4 }
   0xe   : > { %s232_s20 = scalar_lea.vmem %s553_s2, %s439_s17  ;;  %s219_s23 = scalar_lea.vmem %s551_s0, %s429_s16 }
   0xf   : > { %v246_v1 = vld [vmem:[%s232_s20 + $0x8] sm:$0xff]  ;;  %v245_v2 = vld [vmem:[%s232_s20] sm:$0xff]  ;;  %s223_s26 = scalar_lea.vmem %s552_s1, %s429_s16  ;;  %s242_s29 = scalar_lea.vmem %s554_s3, %s439_s17 }
  0x10   : > { %v247_v3 = vld [vmem:[%s219_s23] sm:$0xff]  ;;  %v250_v4 = vpack.c.bf16 %v246_v1, %v246_v1  ;;  %v249_v5 = vpack.c.bf16 %v245_v2, %v245_v2 }
  0x11   : > { %v251_v6 = vld [vmem:[%s223_s26] sm:$0xff]  ;;  %v248_v8 = vpack.c.bf16 %v247_v3, %v247_v3 }
  0x12   : > { %254 = vperm.xlu0 %466, %v251_v6   ;;  %435 = vmatprep.subr.msk.bf16.mxu0 %vm261_vm0, %v250_v4  ;;  %v263_v7 = vsel %vm261_vm0, %v249_v5, 0 }
  0x13   : > { %283 = vmatpush1.bf16.msra.mxu0 %v263_v7 }
  0x16   : > { %436 = vmatmul.mubr.msk.bf16.vlgmr.msra.gmra.mxu0 %vm257_vm1, %v248_v8 }
  0x8d   : > { %v255_v9 = vpop.permute.xlu0 %254 }
  0xd6   : > { %v302_v10 = vpop.f32.mrf.mxu0 }
  0xd7   : > { %v303_v11 = vadd.f32 %v302_v10, %v255_v9 }
  0xd8   : > { %v304_v12 = vpop.f32.mrf.mxu0 }
  0xd9   : > { %v309_v13 = vadd.f32 %v303_v11, %v245_v2  ;;  %v305_v14 = vadd.f32 %v304_v12, %v255_v9 }
  0xda   : > { %v306_v15 = vpop.f32.mrf.mxu0 }
  0xdb   : > { %311 = vst [vmem:[%s242_s29] sm:$0xff] %v309_v13  ;;  %v310_v16 = vadd.f32 %v305_v14, %v246_v1 }
  0xdc   : > { %v307_v17 = vpop.f32.mrf.mxu0 }
  0xdd   : > { %312 = vst [vmem:[%s242_s29 + $0x8] sm:$0xff] %v310_v16 }
  0xde PF: > { %s13_s14 = sadd.s32 1, %s489_s14   ;;  %s555_s12 = smov %s485_s13 }
  0xdf   : > { %p10_p5 = scmp.ge.s32.totalorder %s13_s14, 4   ;;  %s556_s13 = smov %s558_s15 }
  0xe1   :  { %12 = sbr.rel (!%p10_p5) target bundleno = 2 (0x2), region = 68 }

</bundles_post_ra>
